<compile_context>
chip_gen: v7x
topology: tpu7x:2x2x1
jax: 0.10.0
libtpu: 0.0.40
codegen_flags: <defaults>
</compile_context>

<pallas_src>
import functools

import jax
import jax.numpy as jnp
from jax import lax
from jax.experimental import pallas as pl
from jax.experimental.pallas import tpu as pltpu
import numpy as np


def _sbfi_kernel(x_ref, p_ref, w1_ref, w2_ref, w3t_ref, bnb_ref, mask_ref,
                 out_ref, ybuf_ref, *, W, P, E, C):
    """Per-batch-element fused SBFI body (channel-major, flat spatial on lanes).

    x_ref   : (1, C,  P)   decoder features, unpadded flat spatial (P = H*W)
    p_ref   : (1, C2, P)   maxpooled encoder features, unpadded flat spatial
    w1_ref  : (C/2, C)     transform1 1x1 weight
    w2_ref  : (C/2, C2)    transform2 1x1 weight
    w3t_ref : (9, C, C)    conv3x3 weight, tap-major, BN scale folded in
    bnb_ref : (C, 1)       folded inference-BN bias
    mask_ref: (2, P)       row 0: zero at col==0 (dx=-1 taps); row 1: zero at
                           col==W-1 (dx=+1 taps)
    out_ref : (1, C, P)    relu(bn(conv3x3(cat(t1,t2)))) + residual
    ybuf_ref: (C, P+2E)    VMEM scratch: 1x1 outputs behind a zero flat halo
    """
    dt = ybuf_ref.dtype
    Ch = w1_ref.shape[0]

    x = x_ref[0]                                   # (C, P)  f32 (residual source)
    p = p_ref[0]                                   # (C2, P)

    # Zero the flat halos every step (cheap; keeps megacore-"parallel" safe),
    # then write the two 1x1-conv outputs straight into the interior: the
    # channel concat is just the two sublane ranges of the scratch.
    ybuf_ref[:, :E] = jnp.zeros((C, E), dt)
    ybuf_ref[:, E + P:E + P + E] = jnp.zeros((C, E), dt)
    ybuf_ref[:Ch, E:E + P] = jnp.dot(
        w1_ref[...], x.astype(dt), preferred_element_type=jnp.float32).astype(dt)
    ybuf_ref[Ch:, E:E + P] = jnp.dot(
        w2_ref[...], p.astype(dt), preferred_element_type=jnp.float32).astype(dt)

    # 3x3 conv (+ folded BN scale) as 9 accumulating K=C matmuls over shifted
    # slices of the halo'd scratch -- no (9*C, P) im2col slab is materialized.
    mask_l = mask_ref[0:1, :]                      # (1, P), for dx = -1 taps
    mask_r = mask_ref[1:2, :]                      # (1, P), for dx = +1 taps
    acc = None
    t = 0
    for dy in (-1, 0, 1):
        for dx in (-1, 0, 1):
            s = E + dy * W + dx                    # static lane offset
            tap = ybuf_ref[:, s:s + P]             # (C, P)
            if dx == -1:
                tap = tap * mask_l                 # kill row-wrap at col 0
            elif dx == 1:
                tap = tap * mask_r                 # kill row-wrap at col W-1
            contrib = jnp.dot(w3t_ref[t], tap, preferred_element_type=jnp.float32)
            acc = contrib if acc is None else acc + contrib
            t += 1

    # Folded BN bias, ReLU, residual -- all in f32, stored lane-dense.
    out = jnp.maximum(acc + bnb_ref[...], 0.0) + x.astype(jnp.float32)
    out_ref[0] = out.astype(out_ref.dtype)


def sbfi_forward(input_m_decoder, e0, params, *, stride, act_dtype=jnp.float32):
    """SBFI forward (inference-mode BN). Inputs/outputs are NCHW.

    act_dtype=jnp.bfloat16 halves weight/scratch VMEM and uses the bf16 MXU
    rate on v6e/v7x; accumulation, bias/ReLU and the residual stay f32.  The
    default f32 keeps the strict numeric check against the reference.
    """
    x = input_m_decoder
    N, C, H, W = x.shape
    _, C2, _, _ = e0.shape
    assert C % 2 == 0
    Ch = C // 2

    P = H * W                                   # unpadded flat spatial size
    E = -(-(W + 1) // 128) * 128                # lane-aligned flat halo (>= W+1)
    Pe = P + 2 * E

    # maxpool(2, stride) -- plain XLA reduce_window (pooled is ~1/stride^2 of e0).
    pooled = lax.reduce_window(e0, -jnp.inf, lax.max,
                               (1, 1, 2, 2), (1, 1, stride, stride), "VALID")
    assert pooled.shape[2:] == (H, W), "maxpooled e0 must match decoder spatial size"

    # Free views: contiguous NCHW -> NC(H*W).  No padding / concat in HBM.
    x_flat = x.reshape(N, C, P)
    p_flat = pooled.reshape(N, C2, P)

    w1 = params["w1"].reshape(Ch, C).astype(act_dtype)
    w2 = params["w2"].reshape(Ch, C2).astype(act_dtype)

    # Fold inference BatchNorm: per-out-channel scale into the conv3x3 weight,
    # bias kept as one post-matmul add.
    eps = 1e-5
    scale = params["gamma"] / jnp.sqrt(params["var"] + eps)                # (C,)
    bn_bias = (params["beta"] - params["mean"] * scale).reshape(C, 1).astype(jnp.float32)
    w3s = params["w3"] * scale[:, None, None, None]                        # (C, C, 3, 3)
    w3t = jnp.transpose(w3s, (2, 3, 0, 1)).reshape(9, C, C).astype(act_dtype)

    # Column masks that zero the horizontally wrapped taps (dx = -1 / +1).
    cols = jnp.arange(P, dtype=jnp.int32) % W
    masks = jnp.stack([(cols != 0), (cols != W - 1)]).astype(act_dtype)    # (2, P)

    # Explicit VMEM limit sized from the actual per-step blocks (+ headroom).
    bpa = jnp.dtype(act_dtype).itemsize
    bpx = x.dtype.itemsize
    est = (2 * bpx * (C + C2) * P            # input blocks (double-buffered)
           + 2 * bpx * C * P                 # output blocks (double-buffered)
           + bpa * C * Pe                    # halo'd scratch
           + 4 * 3 * C * P                   # f32 accumulator + tap temporaries
           + 2 * bpa * (Ch * (C + C2) + 9 * C * C + 2 * P) + 4 * C)
    vmem_limit = int(min(64 * 2 ** 20, max(32 * 2 ** 20, 2 * est)))

    kernel = functools.partial(_sbfi_kernel, W=W, P=P, E=E, C=C)
    out_flat = pl.pallas_call(
        kernel,
        out_shape=jax.ShapeDtypeStruct((N, C, P), x.dtype),
        grid=(N,),
        in_specs=[
            pl.BlockSpec((1, C, P), lambda n: (n, 0, 0)),
            pl.BlockSpec((1, C2, P), lambda n: (n, 0, 0)),
            # Constant-index weight/bias/mask blocks (never re-fetched).
            pl.BlockSpec((Ch, C), lambda n: (0, 0)),
            pl.BlockSpec((Ch, C2), lambda n: (0, 0)),
            pl.BlockSpec((9, C, C), lambda n: (0, 0, 0)),
            pl.BlockSpec((C, 1), lambda n: (0, 0)),
            pl.BlockSpec((2, P), lambda n: (0, 0)),
        ],
        out_specs=pl.BlockSpec((1, C, P), lambda n: (n, 0, 0)),
        scratch_shapes=[pltpu.VMEM((C, Pe), act_dtype)],
        compiler_params=pltpu.CompilerParams(
            dimension_semantics=("parallel",),
            vmem_limit_bytes=vmem_limit),
    )(x_flat, p_flat, w1, w2, w3t, bn_bias, masks)

    # Free view back to NCHW -- no crop pass, output was never padded.
    return out_flat.reshape(N, C, H, W)


def sbfi_reference(imd, e0, params, *, stride):
    """Pure-JAX reference (NCHW), mirrors the PyTorch module with BN in eval mode."""
    dn = ("NCHW", "OIHW", "NCHW")
    t1 = lax.conv_general_dilated(imd, params["w1"], (1, 1), "VALID",
                                  dimension_numbers=dn)
    e0p = lax.reduce_window(e0, -jnp.inf, lax.max,
                            (1, 1, 2, 2), (1, 1, stride, stride), "VALID")
    t2 = lax.conv_general_dilated(e0p, params["w2"], (1, 1), "VALID",
                                  dimension_numbers=dn)
    xcat = jnp.concatenate([t1, t2], axis=1)
    out = lax.conv_general_dilated(xcat, params["w3"], (1, 1), ((1, 1), (1, 1)),
                                   dimension_numbers=dn)
    scale = params["gamma"] / jnp.sqrt(params["var"] + 1e-5)
    shift = params["beta"] - params["mean"] * scale
    out = out * scale[None, :, None, None] + shift[None, :, None, None]
    return jnp.maximum(out, 0.0) + imd


if __name__ == "__main__":
    planes, planes2, stride = 8, 4, 2
    N, H, W = 2, 16, 16

    key = jax.random.PRNGKey(0)
    kx, ke, k1, k2, k3, kg, kb, km, kv = jax.random.split(key, 9)
    input_m_decoder = jax.random.normal(kx, (N, planes, H, W), jnp.float32)
    e0 = jax.random.normal(ke, (N, planes2, stride * H, stride * W), jnp.float32)

    params = {
        "w1": 0.3 * jax.random.normal(k1, (planes // 2, planes, 1, 1), jnp.float32),
        "w2": 0.3 * jax.random.normal(k2, (planes // 2, planes2, 1, 1), jnp.float32),
        "w3": 0.2 * jax.random.normal(k3, (planes, planes, 3, 3), jnp.float32),
        "gamma": 1.0 + 0.1 * jax.random.normal(kg, (planes,), jnp.float32),
        "beta": 0.1 * jax.random.normal(kb, (planes,), jnp.float32),
        "mean": 0.1 * jax.random.normal(km, (planes,), jnp.float32),
        "var": jax.random.uniform(kv, (planes,), jnp.float32, 0.5, 1.5),
    }

    out = sbfi_forward(input_m_decoder, e0, params, stride=stride)
    out = jax.block_until_ready(out)

    ref = sbfi_reference(input_m_decoder, e0, params, stride=stride)
    np.testing.assert_allclose(np.asarray(out), np.asarray(ref), rtol=2e-4, atol=2e-4)
    print("KERNEL_OK")
</pallas_src>

<mosaic_0001>
module attributes {stable_mosaic.version = 11 : i64} {
  func.func @_sbfi_kernel(%arg0: i32, %arg1: memref<1x8x256xf32, #tpu.memory_space<vmem>>, %arg2: memref<1x4x256xf32, #tpu.memory_space<vmem>>, %arg3: memref<4x8xf32, #tpu.memory_space<vmem>>, %arg4: memref<4x4xf32, #tpu.memory_space<vmem>>, %arg5: memref<9x8x8xf32, #tpu.memory_space<vmem>>, %arg6: memref<8x1xf32, #tpu.memory_space<vmem>>, %arg7: memref<2x256xf32, #tpu.memory_space<vmem>>, %arg8: memref<1x8x256xf32, #tpu.memory_space<vmem>>, %arg9: memref<8x512xf32, #tpu.memory_space<vmem>>) attributes {dimension_semantics = [#tpu.dimension_semantics<parallel>], iteration_bounds = array<i64: 2>, scalar_prefetch = 0 : i64, scratch_operands = 1 : i64, tpu.core_type = #tpu.core_type<tc>, window_params = [{transform_indices = @transform_0, window_bounds = array<i64: 1, 8, 256>}, {transform_indices = @transform_1, window_bounds = array<i64: 1, 4, 256>}, {pipeline_mode = #tpu.pipeline_mode<synchronous>, transform_indices = @transform_2, window_bounds = array<i64: 4, 8>}, {pipeline_mode = #tpu.pipeline_mode<synchronous>, transform_indices = @transform_3, window_bounds = array<i64: 4, 4>}, {pipeline_mode = #tpu.pipeline_mode<synchronous>, transform_indices = @transform_4, window_bounds = array<i64: 9, 8, 8>}, {pipeline_mode = #tpu.pipeline_mode<synchronous>, transform_indices = @transform_5, window_bounds = array<i64: 8, 1>}, {pipeline_mode = #tpu.pipeline_mode<synchronous>, transform_indices = @transform_6, window_bounds = array<i64: 2, 256>}, {transform_indices = @transform_7, window_bounds = array<i64: 1, 8, 256>}]} {
    %c0 = arith.constant 0 : index
    %c0_0 = arith.constant 0 : index
    %c0_1 = arith.constant 0 : index
    %0 = vector.load %arg1[%c0, %c0_0, %c0_1] : memref<1x8x256xf32, #tpu.memory_space<vmem>>, vector<1x8x256xf32>
    %1 = vector.shape_cast %0 : vector<1x8x256xf32> to vector<8x256xf32>
    %c0_2 = arith.constant 0 : index
    %c0_3 = arith.constant 0 : index
    %c0_4 = arith.constant 0 : index
    %2 = vector.load %arg2[%c0_2, %c0_3, %c0_4] : memref<1x4x256xf32, #tpu.memory_space<vmem>>, vector<1x4x256xf32>
    %3 = vector.shape_cast %2 : vector<1x4x256xf32> to vector<4x256xf32>
    %cst = arith.constant 0.000000e+00 : f32
    %4 = vector.broadcast %cst : f32 to vector<8x128xf32>
    %c0_5 = arith.constant 0 : index
    %c0_6 = arith.constant 0 : index
    %5 = vector.load %arg9[%c0_5, %c0_6] : memref<8x512xf32, #tpu.memory_space<vmem>>, vector<8x128xf32>
    tpu.vector_store %arg9[%c0_5, %c0_6], %4 {strides = array<i32>} : memref<8x512xf32, #tpu.memory_space<vmem>>, vector<8x128xf32>,
    %cst_7 = arith.constant 0.000000e+00 : f32
    %6 = vector.broadcast %cst_7 : f32 to vector<8x128xf32>
    %c0_8 = arith.constant 0 : index
    %c384 = arith.constant 384 : index
    %7 = vector.load %arg9[%c0_8, %c384] : memref<8x512xf32, #tpu.memory_space<vmem>>, vector<8x128xf32>
    tpu.vector_store %arg9[%c0_8, %c384], %6 {strides = array<i32>} : memref<8x512xf32, #tpu.memory_space<vmem>>, vector<8x128xf32>,
    %c0_9 = arith.constant 0 : index
    %c0_10 = arith.constant 0 : index
    %8 = vector.load %arg3[%c0_9, %c0_10] : memref<4x8xf32, #tpu.memory_space<vmem>>, vector<4x8xf32>
    %cst_11 = arith.constant dense<0.000000e+00> : vector<4x256xf32>
    %9 = tpu.matmul %8, %1, %cst_11 {dimension_numbers = #tpu.dot_dimension_numbers<[1], [0], [0], [1], [0, 0, 1, 1], [], []>} : vector<4x8xf32>, vector<8x256xf32>, vector<4x256xf32> -> vector<4x256xf32>
    %c0_12 = arith.constant 0 : index
    %c128 = arith.constant 128 : index
    %10 = vector.load %arg9[%c0_12, %c128] : memref<8x512xf32, #tpu.memory_space<vmem>>, vector<4x256xf32>
    tpu.vector_store %arg9[%c0_12, %c128], %9 {strides = array<i32>} : memref<8x512xf32, #tpu.memory_space<vmem>>, vector<4x256xf32>,
    %c0_13 = arith.constant 0 : index
    %c0_14 = arith.constant 0 : index
    %11 = vector.load %arg4[%c0_13, %c0_14] : memref<4x4xf32, #tpu.memory_space<vmem>>, vector<4x4xf32>
    %cst_15 = arith.constant dense<0.000000e+00> : vector<4x256xf32>
    %12 = tpu.matmul %11, %3, %cst_15 {dimension_numbers = #tpu.dot_dimension_numbers<[1], [0], [0], [1], [0, 0, 1, 1], [], []>} : vector<4x4xf32>, vector<4x256xf32>, vector<4x256xf32> -> vector<4x256xf32>
    %c4 = arith.constant 4 : index
    %c128_16 = arith.constant 128 : index
    %13 = vector.load %arg9[%c4, %c128_16] : memref<8x512xf32, #tpu.memory_space<vmem>>, vector<4x256xf32>
    tpu.vector_store %arg9[%c4, %c128_16], %12 {strides = array<i32>} : memref<8x512xf32, #tpu.memory_space<vmem>>, vector<4x256xf32>,
    %c0_17 = arith.constant 0 : index
    %c0_18 = arith.constant 0 : index
    %14 = vector.load %arg7[%c0_17, %c0_18] : memref<2x256xf32, #tpu.memory_space<vmem>>, vector<1x256xf32>
    %c1 = arith.constant 1 : index
    %c0_19 = arith.constant 0 : index
    %15 = vector.load %arg7[%c1, %c0_19] : memref<2x256xf32, #tpu.memory_space<vmem>>, vector<1x256xf32>
    %c0_20 = arith.constant 0 : index
    %c111 = arith.constant 111 : index
    %16 = vector.load %arg9[%c0_20, %c111] : memref<8x512xf32, #tpu.memory_space<vmem>>, vector<8x256xf32>
    %17 = vector.broadcast %14 : vector<1x256xf32> to vector<8x256xf32>
    %18 = arith.mulf %16, %17 : vector<8x256xf32>
    %c0_21 = arith.constant 0 : index
    %c0_22 = arith.constant 0 : index
    %c0_23 = arith.constant 0 : index
    %19 = vector.load %arg5[%c0_21, %c0_22, %c0_23] : memref<9x8x8xf32, #tpu.memory_space<vmem>>, vector<1x8x8xf32>
    %20 = vector.shape_cast %19 : vector<1x8x8xf32> to vector<8x8xf32>
    %cst_24 = arith.constant dense<0.000000e+00> : vector<8x256xf32>
    %21 = tpu.matmul %20, %18, %cst_24 {dimension_numbers = #tpu.dot_dimension_numbers<[1], [0], [0], [1], [0, 0, 1, 1], [], []>} : vector<8x8xf32>, vector<8x256xf32>, vector<8x256xf32> -> vector<8x256xf32>
    %c0_25 = arith.constant 0 : index
    %c112 = arith.constant 112 : index
    %22 = vector.load %arg9[%c0_25, %c112] : memref<8x512xf32, #tpu.memory_space<vmem>>, vector<8x256xf32>
    %c1_26 = arith.constant 1 : index
    %c0_27 = arith.constant 0 : index
    %c0_28 = arith.constant 0 : index
    %23 = vector.load %arg5[%c1_26, %c0_27, %c0_28] : memref<9x8x8xf32, #tpu.memory_space<vmem>>, vector<1x8x8xf32>
    %24 = vector.shape_cast %23 : vector<1x8x8xf32> to vector<8x8xf32>
    %cst_29 = arith.constant dense<0.000000e+00> : vector<8x256xf32>
    %25 = tpu.matmul %24, %22, %cst_29 {dimension_numbers = #tpu.dot_dimension_numbers<[1], [0], [0], [1], [0, 0, 1, 1], [], []>} : vector<8x8xf32>, vector<8x256xf32>, vector<8x256xf32> -> vector<8x256xf32>
    %26 = arith.addf %21, %25 : vector<8x256xf32>
    %c0_30 = arith.constant 0 : index
    %c113 = arith.constant 113 : index
    %27 = vector.load %arg9[%c0_30, %c113] : memref<8x512xf32, #tpu.memory_space<vmem>>, vector<8x256xf32>
    %28 = vector.broadcast %15 : vector<1x256xf32> to vector<8x256xf32>
    %29 = arith.mulf %27, %28 : vector<8x256xf32>
    %c2 = arith.constant 2 : index
    %c0_31 = arith.constant 0 : index
    %c0_32 = arith.constant 0 : index
    %30 = vector.load %arg5[%c2, %c0_31, %c0_32] : memref<9x8x8xf32, #tpu.memory_space<vmem>>, vector<1x8x8xf32>
    %31 = vector.shape_cast %30 : vector<1x8x8xf32> to vector<8x8xf32>
    %cst_33 = arith.constant dense<0.000000e+00> : vector<8x256xf32>
    %32 = tpu.matmul %31, %29, %cst_33 {dimension_numbers = #tpu.dot_dimension_numbers<[1], [0], [0], [1], [0, 0, 1, 1], [], []>} : vector<8x8xf32>, vector<8x256xf32>, vector<8x256xf32> -> vector<8x256xf32>
    %33 = arith.addf %26, %32 : vector<8x256xf32>
    %c0_34 = arith.constant 0 : index
    %c127 = arith.constant 127 : index
    %34 = vector.load %arg9[%c0_34, %c127] : memref<8x512xf32, #tpu.memory_space<vmem>>, vector<8x256xf32>
    %35 = vector.broadcast %14 : vector<1x256xf32> to vector<8x256xf32>
    %36 = arith.mulf %34, %35 : vector<8x256xf32>
    %c3 = arith.constant 3 : index
    %c0_35 = arith.constant 0 : index
    %c0_36 = arith.constant 0 : index
    %37 = vector.load %arg5[%c3, %c0_35, %c0_36] : memref<9x8x8xf32, #tpu.memory_space<vmem>>, vector<1x8x8xf32>
    %38 = vector.shape_cast %37 : vector<1x8x8xf32> to vector<8x8xf32>
    %cst_37 = arith.constant dense<0.000000e+00> : vector<8x256xf32>
    %39 = tpu.matmul %38, %36, %cst_37 {dimension_numbers = #tpu.dot_dimension_numbers<[1], [0], [0], [1], [0, 0, 1, 1], [], []>} : vector<8x8xf32>, vector<8x256xf32>, vector<8x256xf32> -> vector<8x256xf32>
    %40 = arith.addf %33, %39 : vector<8x256xf32>
    %c0_38 = arith.constant 0 : index
    %c128_39 = arith.constant 128 : index
    %41 = vector.load %arg9[%c0_38, %c128_39] : memref<8x512xf32, #tpu.memory_space<vmem>>, vector<8x256xf32>
    %c4_40 = arith.constant 4 : index
    %c0_41 = arith.constant 0 : index
    %c0_42 = arith.constant 0 : index
    %42 = vector.load %arg5[%c4_40, %c0_41, %c0_42] : memref<9x8x8xf32, #tpu.memory_space<vmem>>, vector<1x8x8xf32>
    %43 = vector.shape_cast %42 : vector<1x8x8xf32> to vector<8x8xf32>
    %cst_43 = arith.constant dense<0.000000e+00> : vector<8x256xf32>
    %44 = tpu.matmul %43, %41, %cst_43 {dimension_numbers = #tpu.dot_dimension_numbers<[1], [0], [0], [1], [0, 0, 1, 1], [], []>} : vector<8x8xf32>, vector<8x256xf32>, vector<8x256xf32> -> vector<8x256xf32>
    %45 = arith.addf %40, %44 : vector<8x256xf32>
    %c0_44 = arith.constant 0 : index
    %c129 = arith.constant 129 : index
    %46 = vector.load %arg9[%c0_44, %c129] : memref<8x512xf32, #tpu.memory_space<vmem>>, vector<8x256xf32>
    %47 = vector.broadcast %15 : vector<1x256xf32> to vector<8x256xf32>
    %48 = arith.mulf %46, %47 : vector<8x256xf32>
    %c5 = arith.constant 5 : index
    %c0_45 = arith.constant 0 : index
    %c0_46 = arith.constant 0 : index
    %49 = vector.load %arg5[%c5, %c0_45, %c0_46] : memref<9x8x8xf32, #tpu.memory_space<vmem>>, vector<1x8x8xf32>
    %50 = vector.shape_cast %49 : vector<1x8x8xf32> to vector<8x8xf32>
    %cst_47 = arith.constant dense<0.000000e+00> : vector<8x256xf32>
    %51 = tpu.matmul %50, %48, %cst_47 {dimension_numbers = #tpu.dot_dimension_numbers<[1], [0], [0], [1], [0, 0, 1, 1], [], []>} : vector<8x8xf32>, vector<8x256xf32>, vector<8x256xf32> -> vector<8x256xf32>
    %52 = arith.addf %45, %51 : vector<8x256xf32>
    %c0_48 = arith.constant 0 : index
    %c143 = arith.constant 143 : index
    %53 = vector.load %arg9[%c0_48, %c143] : memref<8x512xf32, #tpu.memory_space<vmem>>, vector<8x256xf32>
    %54 = vector.broadcast %14 : vector<1x256xf32> to vector<8x256xf32>
    %55 = arith.mulf %53, %54 : vector<8x256xf32>
    %c6 = arith.constant 6 : index
    %c0_49 = arith.constant 0 : index
    %c0_50 = arith.constant 0 : index
    %56 = vector.load %arg5[%c6, %c0_49, %c0_50] : memref<9x8x8xf32, #tpu.memory_space<vmem>>, vector<1x8x8xf32>
    %57 = vector.shape_cast %56 : vector<1x8x8xf32> to vector<8x8xf32>
    %cst_51 = arith.constant dense<0.000000e+00> : vector<8x256xf32>
    %58 = tpu.matmul %57, %55, %cst_51 {dimension_numbers = #tpu.dot_dimension_numbers<[1], [0], [0], [1], [0, 0, 1, 1], [], []>} : vector<8x8xf32>, vector<8x256xf32>, vector<8x256xf32> -> vector<8x256xf32>
    %59 = arith.addf %52, %58 : vector<8x256xf32>
    %c0_52 = arith.constant 0 : index
    %c144 = arith.constant 144 : index
    %60 = vector.load %arg9[%c0_52, %c144] : memref<8x512xf32, #tpu.memory_space<vmem>>, vector<8x256xf32>
    %c7 = arith.constant 7 : index
    %c0_53 = arith.constant 0 : index
    %c0_54 = arith.constant 0 : index
    %61 = vector.load %arg5[%c7, %c0_53, %c0_54] : memref<9x8x8xf32, #tpu.memory_space<vmem>>, vector<1x8x8xf32>
    %62 = vector.shape_cast %61 : vector<1x8x8xf32> to vector<8x8xf32>
    %cst_55 = arith.constant dense<0.000000e+00> : vector<8x256xf32>
    %63 = tpu.matmul %62, %60, %cst_55 {dimension_numbers = #tpu.dot_dimension_numbers<[1], [0], [0], [1], [0, 0, 1, 1], [], []>} : vector<8x8xf32>, vector<8x256xf32>, vector<8x256xf32> -> vector<8x256xf32>
    %64 = arith.addf %59, %63 : vector<8x256xf32>
    %c0_56 = arith.constant 0 : index
    %c145 = arith.constant 145 : index
    %65 = vector.load %arg9[%c0_56, %c145] : memref<8x512xf32, #tpu.memory_space<vmem>>, vector<8x256xf32>
    %66 = vector.broadcast %15 : vector<1x256xf32> to vector<8x256xf32>
    %67 = arith.mulf %65, %66 : vector<8x256xf32>
    %c8 = arith.constant 8 : index
    %c0_57 = arith.constant 0 : index
    %c0_58 = arith.constant 0 : index
    %68 = vector.load %arg5[%c8, %c0_57, %c0_58] : memref<9x8x8xf32, #tpu.memory_space<vmem>>, vector<1x8x8xf32>
    %69 = vector.shape_cast %68 : vector<1x8x8xf32> to vector<8x8xf32>
    %cst_59 = arith.constant dense<0.000000e+00> : vector<8x256xf32>
    %70 = tpu.matmul %69, %67, %cst_59 {dimension_numbers = #tpu.dot_dimension_numbers<[1], [0], [0], [1], [0, 0, 1, 1], [], []>} : vector<8x8xf32>, vector<8x256xf32>, vector<8x256xf32> -> vector<8x256xf32>
    %71 = arith.addf %64, %70 : vector<8x256xf32>
    %c0_60 = arith.constant 0 : index
    %c0_61 = arith.constant 0 : index
    %72 = vector.load %arg6[%c0_60, %c0_61] : memref<8x1xf32, #tpu.memory_space<vmem>>, vector<8x1xf32>
    %73 = vector.broadcast %72 : vector<8x1xf32> to vector<8x256xf32>
    %74 = arith.addf %71, %73 : vector<8x256xf32>
    %cst_62 = arith.constant 0.000000e+00 : f32
    %75 = vector.broadcast %cst_62 : f32 to vector<8x256xf32>
    %76 = arith.maximumf %74, %75 : vector<8x256xf32>
    %77 = arith.addf %76, %1 : vector<8x256xf32>
    %c0_63 = arith.constant 0 : index
    %c0_64 = arith.constant 0 : index
    %c0_65 = arith.constant 0 : index
    %78 = vector.load %arg8[%c0_63, %c0_64, %c0_65] : memref<1x8x256xf32, #tpu.memory_space<vmem>>, vector<1x8x256xf32>
    %79 = vector.shape_cast %78 : vector<1x8x256xf32> to vector<8x256xf32>
    %80 = vector.shape_cast %77 : vector<8x256xf32> to vector<1x8x256xf32>
    tpu.vector_store %arg8[%c0_63, %c0_64, %c0_65], %80 {strides = array<i32>} : memref<1x8x256xf32, #tpu.memory_space<vmem>>, vector<1x8x256xf32>,
    return
  }
  func.func @transform_0(%arg0: i32) -> (i32, i32, i32) {
    %c0_i32 = arith.constant 0 : i32
    %c0_i32_0 = arith.constant 0 : i32
    %c0_i32_1 = arith.constant 0 : i32
    return %arg0, %c0_i32, %c0_i32_0 : i32, i32, i32
  }
  func.func @transform_1(%arg0: i32) -> (i32, i32, i32) {
    %c0_i32 = arith.constant 0 : i32
    %c0_i32_0 = arith.constant 0 : i32
    %c0_i32_1 = arith.constant 0 : i32
    return %arg0, %c0_i32, %c0_i32_0 : i32, i32, i32
  }
  func.func @transform_2(%arg0: i32) -> (i32, i32) {
    %c0_i32 = arith.constant 0 : i32
    %c0_i32_0 = arith.constant 0 : i32
    %c0_i32_1 = arith.constant 0 : i32
    return %c0_i32, %c0_i32_0 : i32, i32
  }
  func.func @transform_3(%arg0: i32) -> (i32, i32) {
    %c0_i32 = arith.constant 0 : i32
    %c0_i32_0 = arith.constant 0 : i32
    %c0_i32_1 = arith.constant 0 : i32
    return %c0_i32, %c0_i32_0 : i32, i32
  }
  func.func @transform_4(%arg0: i32) -> (i32, i32, i32) {
    %c0_i32 = arith.constant 0 : i32
    %c0_i32_0 = arith.constant 0 : i32
    %c0_i32_1 = arith.constant 0 : i32
    %c0_i32_2 = arith.constant 0 : i32
    return %c0_i32, %c0_i32_0, %c0_i32_1 : i32, i32, i32
  }
  func.func @transform_5(%arg0: i32) -> (i32, i32) {
    %c0_i32 = arith.constant 0 : i32
    %c0_i32_0 = arith.constant 0 : i32
    %c0_i32_1 = arith.constant 0 : i32
    return %c0_i32, %c0_i32_0 : i32, i32
  }
  func.func @transform_6(%arg0: i32) -> (i32, i32) {
    %c0_i32 = arith.constant 0 : i32
    %c0_i32_0 = arith.constant 0 : i32
    %c0_i32_1 = arith.constant 0 : i32
    return %c0_i32, %c0_i32_0 : i32, i32
  }
  func.func @transform_7(%arg0: i32) -> (i32, i32, i32) {
    %c0_i32 = arith.constant 0 : i32
    %c0_i32_0 = arith.constant 0 : i32
    %c0_i32_1 = arith.constant 0 : i32
    return %arg0, %c0_i32, %c0_i32_0 : i32, i32, i32
  }
}

</mosaic_0001>

<bundles_post_ra>
// kernel: tpu_custom_call.1
= control target key start
LH: loop header
LB: loop body
LE: loop exit
PB: predicated region body
PF: predicated region fallthrough
CT: control target
= control target key end

     0   :  { %12 = vsyncpa [#allocation4], 0  ;;  %s1940_s0 = inlined_call_operand.vmem [shape: f32[2,8,256], index: 0, kind: input, shape index: {}]   ;;  %s1941_s1 = inlined_call_operand.vmem [shape: f32[2,4,256], index: 1, kind: input, shape index: {}]   ;;  %s1942_s2 = inlined_call_operand.vmem [shape: f32[4,8], index: 2, kind: input, shape index: {}]   ;;  %s1943_s3 = inlined_call_operand.vmem [shape: f32[4,4], index: 3, kind: input, shape index: {}]   ;;  %s1944_s4 = inlined_call_operand.vmem [shape: f32[9,8,8], index: 4, kind: input, shape index: {}]   ;;  %s1945_s5 = inlined_call_operand.vmem [shape: f32[8,1], index: 5, kind: input, shape index: {}]   ;;  %s1946_s6 = inlined_call_operand.vmem [shape: f32[2,256], index: 6, kind: input, shape index: {}]   ;;  %s1947_s7 = inlined_call_operand.hbm [shape: f32[2,8,256], index: 7, kind: output, shape index: {}]  }
   0x1   :  { %14 = vsyncpa [#allocation4 + $0x1], 0  ;;  %s1694_s24 = smov 0   ;;  %s1696_s25 = smov 0  }
   0x2   :  { %s1698_s26 = smov 0   ;;  %s1700_s27 = smov 0  }
   0x3 LB: > { %s1715_s28 = sadd.s32 4294967295, %s1641_s27   ;;  %s1473_s29 = sadd.s32 4294967294, %s1641_s27   ;;  %s1641_s27 = sphi %s1700_s27, %s1953_s27   ;;  %s1637_s26 = sphi %s1698_s26, %s1952_s26   ;;  %s1633_s25 = sphi %s1696_s25, %s1951_s25   ;;  %s1629_s24 = sphi %s1694_s24, %s1950_s24  }
   0x4   : > { %s1719_s30 = sadd.s32 1, %s1641_s27   ;;  %s184_s8 = sadd.s32 1, %s1637_s26 }
   0x5   : > { %s181_s9 = ssub.s32 %s1641_s27, %s1719_s30  ;;  %p194_p0 = scmp.ne.s32.totalorder %s1637_s26, %s1633_s25 }
   0x6   : > { %p182_p1 = scmp.eq.s32.totalorder %s181_s9, 0  ;;  %p195_p2 = scmp.eq.s32.totalorder %s1715_s28, 1 }
   0x7   : > { %p200_p3 = scmp.ne.s32.totalorder %s1633_s25, %s1629_s24  ;;  %p201_p4 = scmp.eq.s32.totalorder %s1473_s29, 1 }
   0x8   : > { %s1730_s10 = scalar_select %p182_p1, %s1637_s26, %s184_s8  }
   0x9   : > { %p1732_p5 = por %p195_p2, %p194_p0  ;;  %p1736_p6 = por %p201_p4, %p200_p3 }
   0xa   : > { %p1476_p7 = scmp.ge.s32.totalorder %s1641_s27, 1  ;;  %p250_p8 = scmp.lt.s32.totalorder %s1641_s27, 3 }
   0xc   : > { %p251_p9 = pnand %p1476_p7, %p250_p8 }
   0xd   : > { %p287_p10 = scmp.lt.s32.totalorder (!%p251_p9), %s1715_s28, 1  ;;  %v478_v0 = vlaneseq (!%p251_p9)  ;;  %v1643_v1 = vmov (!%p251_p9), 0.0   ;;  %v1486_v2 = vld [vmem:[%s1946_s6 + $0x1] ss:$2 sm:$0x3] (!%p251_p9)  ;;  %vm303_vm0 = vcmask (!%p251_p9), 64512  }
   0xe   : > { %254 = sbr.rel (%p251_p9) target bundleno = 653 (0x28d), region = 48  ;;  %371 = vmatprep.mubr.f32.mxu1 (!%p251_p9), %v1643_v1  ;;  %885 = vmatprep.mubr.f32.mxu0 (!%p251_p9), %v1643_v1  ;;  %v471_v4 = vld [vmem:[%s1946_s6] ss:$2 sm:$0x3] (!%p251_p9)  ;;  %vm387_vm1 = vcmask (!%p251_p9), 1043456   ;;  %vm383_vm2 = vcmask (!%p251_p9), 31744  }
   0xf   : > { %v479_v3 = vshrl.u32 (!%p251_p9), %v478_v0, 7  ;;  %v302_v7 = vld [vmem:[%s1942_s2] sm:$0xf] (!%p251_p9)  ;;  %s1645_s17 = smov (!%p251_p9), 127   ;;  %s1648_s20 = smov (!%p251_p9), 113   ;;  %vm794_vm3 = vcmask (!%p251_p9), 1039360  }
  0x10   : > { %v380_v15 = vld [vmem:[%s1943_s3] sm:$0xf] (!%p251_p9)  ;;  %s1649_s21 = smov (!%p251_p9), 17   ;;  %vm813_vm4 = vcmask (!%p251_p9), 7168   ;;  %vm490_vm5 = vcmask (!%p251_p9), 908288   ;;  %vm709_vm6 = vcmask (!%p251_p9), 121856  }
  0x11   : > { %v480_v5 = vsub.s32 (!%p251_p9), 0, %v479_v3  ;;  %v484_v6 = vsub.s32 (!%p251_p9), 1, %v479_v3  ;;  %s1651_s23 = smov (!%p251_p9), 112   ;;  %vm690_vm7 = vcmask (!%p251_p9), 924672   ;;  %vm598_vm8 = vcmask (!%p251_p9), 138240   ;;  %v1373_v62 = vld [vmem:[%s1945_s5] sm:$0xff] (!%p251_p9) }
  0x12   : > { %v1652_v57 = vmov (!%p251_p9), 0   ;;  %vm510_vm9 = vcmask (!%p251_p9), 130048   ;;  %vm1190_vm10 = vcmask (!%p251_p9), 916480   ;;  %s284_s16 = sand.u32 (!%p251_p9), 1, %s1633_s25  }
  0x13   : > { %v681_v11 = vrot.slane (!%p251_p9), %v1486_v2, %v480_v5  ;;  %v481_v13 = vrot.slane (!%p251_p9), %v471_v4, %v480_v5  ;;  %v685_v14 = vrot.slane (!%p251_p9), %v1486_v2, %v484_v6  ;;  %v485_v16 = vrot.slane (!%p251_p9), %v471_v4, %v484_v6  ;;  %1577 = vset.pattern.permute.xlu0 (!%p251_p9), %v1652_v57  ;;  %v1492_v4 = vld [vmem:[%s1944_s4 + $0x18] sm:$0xff] (!%p251_p9) }
  0x15   : > { %s288_s13 = scalar_select %p287_p10, %s1715_s28, 1  ;;  %790 = vrot.lane.b32.xlu0 %v481_v13, %s1645_s17 }
  0x17   : > { %s1509_s18 = sshll.u32 %s288_s13, 4  ;;  %s1510_s19 = sshll.u32 %s288_s13, 3 }
  0x18   : > { %s291_s22 = scalar_lea.vmem %s1940_s0, %s1509_s18  ;;  %s296_s8 = scalar_lea.vmem %s1941_s1, %s1510_s19 }
  0x19   : > { %v1761_v8 = vld [vmem:[%s291_s22 + $0x8] sm:$0xff]  ;;  %v299_v9 = vld [vmem:[%s296_s8] sm:$0xff]  ;;  %s1644_s13 = smov 1   ;;  %792 = vrot.lane.b32.xlu0 %v485_v16, %s1645_s17  ;;  %s1646_s18 = smov 15  }
  0x1a   : > { %v1763_v10 = vld [vmem:[%s291_s22] sm:$0xff]  ;;  %307 = vmatprep.subr.mxu1 %v1761_v8  ;;  %v382_v12 = vcombine.high %v299_v9, %v299_v9  ;;  %975 = vrot.lane.b32.xlu1 %v681_v11, %s1644_s13  ;;  %s1647_s19 = smov 111   ;;  %s1650_s22 = smov 16  }
  0x1b   : > { %308 = vmatpush1.msra.mxu1 %v1763_v10  ;;  %s1653_s8 = smov [#allocation3]  }
  0x1c   : > { %1482 = vmatmul.mubr.msk.f32.vlgmr.msra.gmra.mrb[0].mxu1 %vm303_vm0, %v302_v7  ;;  %1483 = vmatprep.subr.msk.mxu1 %vm387_vm1, %v382_v12  ;;  %v1494_v12 = vld [vmem:[%s1944_s4 + $0x20] sm:$0xff]  ;;  %s1583_s9 = sshll.u32 %s1653_s8, 4  ;;  %s1584_s9 = int_to_ptr.vmem [resolvable:$false] %s1583_s9 }
  0x1d   : > { %1484 = vmatpush1.msk.msra.mxu1 %vm387_vm1, %v299_v9  ;;  %456 = vmatprep.mubr.f32.mxu1 %v1643_v1  ;;  %s1585_s14 = scalar_lea.vmem %s1584_s9, 512 }
  0x1e   : > { %977 = vrot.lane.b32.xlu1 %v685_v14, %s1644_s13  ;;  %1077 = vrot.lane.b32.xlu0 %v481_v13, %s1646_s18 }
  0x20   : > { %1485 = vmatmul.mubr.msk.f32.vlgmr.msra.gmra.mrb[2].mxu1 %vm383_vm2, %v380_v15 }
  0x21   : > { %582 = vmatprep.mubr.f32.mxu1 %v1643_v1 }
  0x22   : > { %1079 = vrot.lane.b32.xlu1 %v485_v16, %s1646_s18  ;;  %486 = vrot.lane.b32.xlu0 %v481_v13, %s1647_s19 }
  0x26   : > { %488 = vrot.lane.b32.xlu1 %v485_v16, %s1647_s19  ;;  %686 = vrot.lane.b32.xlu0 %v681_v11, %s1648_s20  ;;  %v1487_v16 = vld [vmem:[%s1944_s4 + $0x8] sm:$0xff] }
  0x2a   : > { %688 = vrot.lane.b32.xlu1 %v685_v14, %s1648_s20  ;;  %1271 = vrot.lane.b32.xlu0 %v681_v11, %s1649_s21 }
  0x2e   : > { %1273 = vrot.lane.b32.xlu1 %v685_v14, %s1649_s21 }
  0x87   : > { %v791_v23 = vpop.permute.xlu0 %790 }
  0x88   : > { %v799_v31 = vmul.f32 0.0, %v791_v23 }
  0x8b   : > { %v793_v25 = vpop.permute.xlu0 %792 }
  0x8c   : > { %v976_v24 = vpop.permute.xlu1 %975  ;;  %v795_v26 = vsel %vm794_vm3, %v791_v23, %v793_v25 }
  0x90   : > { %v978_v32 = vpop.permute.xlu1 %977  ;;  %v1078_v36 = vpop.permute.xlu0 %1077 }
  0x91   : > { %v985_v34 = vmul.f32 0.0, %v978_v32  ;;  %v979_v38 = vsel %vm813_vm4, %v976_v24, %v978_v32 }
  0x94   : > { %v1080_v35 = vpop.permute.xlu1 %1079  ;;  %v487_v40 = vpop.permute.xlu0 %486 }
  0x95   : > { %v1087_v37 = vmul.f32 0.0, %v1080_v35  ;;  %v1081_v44 = vsel %vm709_vm6, %v1078_v36, %v1080_v35  ;;  %v495_v49 = vmul.f32 0.0, %v487_v40 }
  0x98   : > { %v489_v39 = vpop.permute.xlu1 %488  ;;  %v687_v48 = vpop.permute.xlu0 %686 }
  0x99   : > { %v491_v41 = vsel %vm490_vm5, %v487_v40, %v489_v39  ;;  %v695_v60 = vmul.f32 0.0, %v687_v48 }
  0x9c   : > { %v689_v47 = vpop.permute.xlu1 %688  ;;  %v1272_v53 = vpop.permute.xlu0 %1271 }
  0x9d   : > { %v691_v51 = vsel %vm690_vm7, %v687_v48, %v689_v47 }
  0xa0   : > { %v1274_v52 = vpop.permute.xlu1 %1273 }
  0xa1   : > { %v1281_v54 = vmul.f32 0.0, %v1274_v52  ;;  %v1275_v56 = vsel %vm598_vm8, %v1272_v53, %v1274_v52 }
  0xef   : > { %v373_v17 = vpop.f32.mrb[0].mxu1 }
  0xf0   : > { %378 = vst [vmem:[#allocation2 + $0x8] sm:$0xf] %v373_v17  ;;  %v375_v18 = vpop.f32.mrb[1].mxu1 }
  0xf1   : > { %379 = vst [vmem:[#allocation2 + $0x10] sm:$0xf] %v375_v18 }
  0xf3   : > { %v458_v19 = vpop.f32.mrb[2].mxu1 }
  0xf4   : > { %v465_v20 = vrot.slane %v458_v19, 4  ;;  %v460_v21 = vpop.f32.mrb[3].mxu1 }
  0xf5   : > { %v466_v22 = vrot.slane %v460_v21, 4 }
  0xf6   : > { %469 = vst [vmem:[#allocation2 + $0x8] sm:$0xf0] %v465_v20 }
  0xf7   : > { %470 = vst [vmem:[#allocation2 + $0x10] sm:$0xf0] %v466_v22  ;;  %v1496_v22 = vld [vmem:[%s1944_s4 + $0x28] sm:$0xff] }
  0xfd   : > { %v1786_v27 = vld [vmem:[#allocation2 + $0x8] sm:$0xff] }
  0xfe   : > { %v1788_v28 = vld [vmem:[#allocation2 + $0x10] sm:$0xff]  ;;  %v800_v29 = vmul.f32 %v795_v26, %v1786_v27  ;;  %v983_v33 = vmul.f32 %v976_v24, %v1786_v27  ;;  %v496_v43 = vmul.f32 %v491_v41, %v1786_v27  ;;  %v1085_v45 = vmul.f32 %v1078_v36, %v1786_v27  ;;  %v498_v36 = vld [vmem:[%s1944_s4] sm:$0xff] }
  0xff   : > { %v801_v30 = vmul.f32 %v793_v25, %v1788_v28  ;;  %v984_v42 = vmul.f32 %v979_v38, %v1788_v28  ;;  %v1086_v46 = vmul.f32 %v1081_v44, %v1788_v28  ;;  %v497_v50 = vmul.f32 %v489_v39, %v1788_v28  ;;  %v1500_v39 = vld [vmem:[%s1944_s4 + $0x38] sm:$0xff] }
 0x100   : > { %809 = vrot.lane.b32.xlu0 %v800_v29, %s1644_s13  ;;  %v696_v55 = vmul.f32 %v691_v51, %v1786_v27  ;;  %v1280_v58 = vmul.f32 %v1275_v56, %v1788_v28  ;;  %v697_v59 = vmul.f32 %v689_v47, %v1788_v28  ;;  %v1279_v61 = vmul.f32 %v1272_v53, %v1786_v27  ;;  %v1498_v29 = vld [vmem:[%s1944_s4 + $0x30] sm:$0xff] }
 0x101   : > { %811 = vrot.lane.b32.xlu1 %v801_v30, %s1644_s13 }
 0x104   : > { %807 = vrot.lane.b32.xlu0 %v799_v31, %s1644_s13 }
 0x105   : > { %991 = vrot.lane.b32.xlu1 %v983_v33, %s1645_s17 }
 0x108   : > { %995 = vrot.lane.b32.xlu0 %v985_v34, %s1645_s17 }
 0x109   : > { %508 = vrot.lane.b32.xlu1 %v1788_v28, %s1650_s22 }
 0x10c   : > { %506 = vrot.lane.b32.xlu0 %v1786_v27, %s1650_s22 }
 0x10d   : > { %1097 = vrot.lane.b32.xlu1 %v1087_v37, %s1648_s20 }
 0x110   : > { %504 = vrot.lane.b32.xlu0 %v1643_v1, %s1650_s22 }
 0x111   : > { %993 = vrot.lane.b32.xlu1 %v984_v42, %s1645_s17  ;;  %s1477_s17 = sshll.u32 %s284_s16, 4 }
 0x114   : > { %594 = vrot.lane.b32.xlu0 %v496_v43, %s1649_s21 }
 0x115   : > { %1093 = vrot.lane.b32.xlu1 %v1085_v45, %s1648_s20 }
 0x118   : > { %1095 = vrot.lane.b32.xlu0 %v1086_v46, %s1648_s20  ;;  %v1490_v46 = vld [vmem:[%s1944_s4 + $0x10] sm:$0xff] }
 0x119   : > { %1188 = vrot.lane.b32.xlu1 %v1643_v1, %s1651_s23 }
 0x11c   : > { %1186 = vrot.lane.b32.xlu0 %v1788_v28, %s1651_s23 }
 0x11d   : > { %1184 = vrot.lane.b32.xlu1 %v1786_v27, %s1651_s23 }
 0x120   : > { %592 = vrot.lane.b32.xlu0 %v495_v49, %s1649_s21 }
 0x121   : > { %596 = vrot.lane.b32.xlu1 %v497_v50, %s1649_s21 }
 0x124   : > { %705 = vrot.lane.b32.xlu0 %v696_v55, %s1646_s18 }
 0x125   : > { %1291 = vrot.lane.b32.xlu1 %v1281_v54, %s1647_s19 }
 0x128   : > { %1289 = vrot.lane.b32.xlu0 %v1280_v58, %s1647_s19 }
 0x129   : > { %707 = vrot.lane.b32.xlu1 %v697_v59, %s1646_s18 }
 0x12c   : > { %703 = vrot.lane.b32.xlu0 %v695_v60, %s1646_s18  ;;  %s1511_s18 = sshll.u32 %s1715_s28, 8  ;;  %s1388_s28 = scalar_lea.sflag [#allocation4], %s284_s16 }
 0x12d   : > { %1287 = vrot.lane.b32.xlu1 %v1279_v61, %s1647_s19  ;;  %s286_s19 = scalar_lea.vmem [#allocation3], %s1477_s17  ;;  %s1898_s23 = scalar_lea.hbm %s1947_s7, %s1511_s18 }
 0x12e   : > { %s1402_s20 = sshll.u32 %s286_s19, 4  ;;  %s1900_s20 = int_to_ptr.vmem [resolvable:$true] %s1402_s20 }
 0x12f   : > { %s1579_s29 = scalar_lea.vmem %s1900_s20, 256  ;;  %p1586_p0 = scmp.lt.s32.totalorder %s1900_s20, %s1584_s9 }
 0x130   : > { %1376 = vperm.xlu0 %1577, %v1373_v62   ;;  %p1580_p11 = scmp.ne.s32.totalorder %s1900_s20, %s1579_s29  ;;  %p1587_p1 = scmp.lt.s32.totalorder %s1585_s14, %s1579_s29 }
 0x132   : > { %p1581_p12 = pnand %p1580_p11, %p1732_p5  ;;  %p1588_p2 = por %p1587_p1, %p1586_p0 }
 0x134   : > { %p1582_p13 = pneg %p1581_p12 }
 0x136   : > { %p1589_p3 = pnand %p1588_p2, %p1582_p13 }
 0x172   : > { %v810_v63 = vpop.permute.xlu0 %809 }
 0x173   : > { %v812_v0 = vpop.permute.xlu1 %811 }
 0x174   : > { %v815_v2 = vsel %vm813_vm4, %v810_v63, %v812_v0 }
 0x175   : > { %821 = vmatprep.subr.mxu0 %v815_v2 }
 0x176   : > { %v808_v3 = vpop.permute.xlu0 %807 }
 0x177   : > { %v992_v5 = vpop.permute.xlu1 %991  ;;  %v814_v6 = vsel %vm813_vm4, %v808_v3, %v810_v63 }
 0x178   : > { %822 = vmatpush1.msra.mxu0 %v814_v6 }
 0x179   : > { %1493 = vmatmul.mubr.msk.f32.vlgmr.msra.gmra.mrb[0].mxu0 %vm303_vm0, %v1492_v4  ;;  %899 = vmatprep.subr.mxu0 %v1788_v28 }
 0x17a   : > { %v996_v7 = vpop.permute.xlu0 %995  ;;  %900 = vmatpush1.msra.mxu0 %v1786_v27  ;;  %963 = vmatprep.mubr.f32.mxu0 %v1643_v1 }
 0x17b   : > { %v509_v9 = vpop.permute.xlu1 %508 }
 0x17e   : > { %v507_v11 = vpop.permute.xlu0 %506 }
 0x17f   : > { %v1098_v13 = vpop.permute.xlu1 %1097  ;;  %v512_v14 = vsel %vm510_vm9, %v507_v11, %v509_v9 }
 0x180   : > { %518 = vmatprep.subr.mxu1 %v512_v14 }
 0x181   : > { %1495 = vmatmul.mubr.msk.f32.vlgmr.msra.gmra.mrb[0].mxu0 %vm303_vm0, %v1494_v12 }
 0x182   : > { %v505_v15 = vpop.permute.xlu0 %504  ;;  %1068 = vmatprep.mubr.f32.mxu0 %v1643_v1 }
 0x183   : > { %v511_v17 = vsel %vm510_vm9, %v505_v15, %v507_v11  ;;  %v994_v18 = vpop.permute.xlu1 %993 }
 0x184   : > { %v997_v19 = vsel %vm794_vm3, %v992_v5, %v994_v18  ;;  %519 = vmatpush1.msra.mxu1 %v511_v17  ;;  %v998_v20 = vsel %vm794_vm3, %v994_v18, %v996_v7 }
 0x185   : > { %1004 = vmatprep.subr.mxu0 %v998_v20  ;;  %1488 = vmatmul.mubr.msk.f32.vlgmr.msra.gmra.mrb[4].mxu1 %vm303_vm0, %v1487_v16 }
 0x186   : > { %v595_v21 = vpop.permute.xlu0 %594  ;;  %1005 = vmatpush1.msra.mxu0 %v997_v19  ;;  %670 = vmatprep.mubr.f32.mxu1 %v1643_v1 }
 0x187   : > { %v1094_v23 = vpop.permute.xlu1 %1093 }
 0x189   : > { %1497 = vmatmul.mubr.msk.f32.vlgmr.msra.gmra.mrb[0].mxu0 %vm303_vm0, %v1496_v22 }
 0x18a   : > { %v1096_v24 = vpop.permute.xlu0 %1095  ;;  %1170 = vmatprep.mubr.f32.mxu0 %v1643_v1 }
 0x18b   : > { %v1099_v25 = vsel %vm690_vm7, %v1094_v23, %v1096_v24  ;;  %v1189_v26 = vpop.permute.xlu1 %1188  ;;  %v1100_v27 = vsel %vm690_vm7, %v1096_v24, %v1098_v13 }
 0x18c   : > { %1106 = vmatprep.subr.mxu0 %v1100_v27 }
 0x18d   : > { %1107 = vmatpush1.msra.mxu0 %v1099_v25 }
 0x18e   : > { %v1187_v28 = vpop.permute.xlu0 %1186 }
 0x18f   : > { %v1185_v30 = vpop.permute.xlu1 %1184  ;;  %v1192_v31 = vsel %vm1190_vm10, %v1187_v28, %v1189_v26 }
 0x190   : > { %v1191_v32 = vsel %vm1190_vm10, %v1185_v30, %v1187_v28  ;;  %1198 = vmatprep.subr.mxu0 %v1192_v31 }
 0x191   : > { %1499 = vmatmul.mubr.msk.f32.vlgmr.msra.gmra.mrb[0].mxu0 %vm303_vm0, %v1498_v29 }
 0x192   : > { %1199 = vmatpush1.msra.mxu0 %v1191_v32  ;;  %v593_v33 = vpop.permute.xlu0 %592  ;;  %1262 = vmatprep.mubr.f32.mxu0 %v1643_v1 }
 0x193   : > { %v597_v34 = vpop.permute.xlu1 %596  ;;  %v599_v37 = vsel %vm598_vm8, %v593_v33, %v595_v21 }
 0x194   : > { %v600_v35 = vsel %vm598_vm8, %v595_v21, %v597_v34 }
 0x195   : > { %606 = vmatprep.subr.mxu1 %v600_v35 }
 0x196   : > { %v706_v38 = vpop.permute.xlu0 %705  ;;  %607 = vmatpush1.msra.mxu1 %v599_v37 }
 0x197   : > { %v1292_v40 = vpop.permute.xlu1 %1291  ;;  %1489 = vmatmul.mubr.msk.f32.vlgmr.msra.gmra.mrb[4].mxu1 %vm303_vm0, %v498_v36 }
 0x198   : > { %781 = vmatprep.mubr.f32.mxu1 %v1643_v1 }
 0x199   : > { %1501 = vmatmul.mubr.msk.f32.vlgmr.msra.gmra.mrb[0].mxu0 %vm303_vm0, %v1500_v39 }
 0x19a   : > { %v1290_v41 = vpop.permute.xlu0 %1289  ;;  %1364 = vmatprep.mubr.f32.mxu0 %v1643_v1  ;;  %v1502_v1 = vld [vmem:[%s1944_s4 + $0x40] sm:$0xff] }
 0x19b   : > { %v708_v42 = vpop.permute.xlu1 %707  ;;  %v1294_v43 = vsel %vm490_vm5, %v1290_v41, %v1292_v40 }
 0x19c   : > { %1300 = vmatprep.subr.mxu0 %v1294_v43  ;;  %v711_v44 = vsel %vm709_vm6, %v706_v38, %v708_v42 }
 0x19d   : > { %717 = vmatprep.subr.mxu1 %v711_v44 }
 0x19e   : > { %v704_v45 = vpop.permute.xlu0 %703 }
 0x19f   : > { %v710_v47 = vsel %vm709_vm6, %v704_v45, %v706_v38  ;;  %v1288_v48 = vpop.permute.xlu1 %1287 }
 0x1a0   : > { %v1293_v49 = vsel %vm490_vm5, %v1288_v48, %v1290_v41  ;;  %718 = vmatpush1.msra.mxu1 %v710_v47 }
 0x1a1   : > { %1491 = vmatmul.mubr.msk.f32.vlgmr.msra.gmra.mrb[4].mxu1 %vm303_vm0, %v1490_v46  ;;  %1301 = vmatpush1.msra.mxu0 %v1293_v49 }
 0x1a2   : > { %1503 = vmatmul.mubr.msk.f32.vlgmr.msra.gmra.mrb[0].mxu0 %vm303_vm0, %v1502_v1 }
 0x1af   : > { %v1377_v51 = vpop.permute.xlu0 %1376 }
 0x274   : > { %v783_v50 = vpop.f32.mrb[4].mxu1 }
 0x275   : > { %v785_v52 = vpop.f32.mrb[5].mxu1  ;;  %v1366_v53 = vpop.f32.mrb[0].mxu0 }
 0x276   : > { %v1512_v54 = vadd.f32 %v1366_v53, %v783_v50  ;;  %v1368_v55 = vpop.f32.mrb[1].mxu0 }
 0x277   : > { %v1513_v56 = vadd.f32 %v1368_v55, %v785_v52 }
 0x278   : > { %v1379_v57 = vadd.f32 %v1512_v54, %v1377_v51 }
 0x279   : > { %v1380_v58 = vadd.f32 %v1513_v56, %v1377_v51 }
 0x27a   : > { %v1381_v59 = vmax.f32 %v1379_v57, 0.0 }
 0x27b   : > { %v1382_v60 = vmax.f32 %v1380_v58, 0.0 }
 0x27c   : > { %v1383_v61 = vadd.f32 %v1381_v59, %v1763_v10 }
 0x27d   : > { %v1384_v62 = vadd.f32 %v1382_v60, %v1761_v8 }
 0x27e   : > { %1385 = vst [vmem:[%s286_s19] sm:$0xff] %v1383_v61 }
 0x27f   : > { %1386 = vst [vmem:[%s286_s19 + $0x8] sm:$0xff] %v1384_v62 }
 0x280   : > { %1592 = shalt.err (!%p1589_p3)
}
 0x281   : > { %s1593_s13 = scalar_lea.hbm %s1898_s23, 256  ;;  %s1597_s17 = scalar_lea.hbm %s1947_s7, 512 }
 0x282   : > { %p1594_p4 = scmp.ne.s32.totalorder %s1898_s23, %s1593_s13  ;;  %p1598_p9 = scmp.lt.u32.totalorder %s1898_s23, %s1947_s7 }
 0x283   : > { %p1599_p10 = scmp.lt.u32.totalorder %s1597_s17, %s1593_s13  ;;  %p1601_p12 = scmp.lt.u32.totalorder %s1593_s13, %s1898_s23 }
 0x284   : > { %p1595_p7 = pnand %p1594_p4, %p1732_p5 }
 0x285   : > { %p1600_p11 = por %p1599_p10, %p1598_p9 }
 0x286   : > { %p1596_p8 = pneg %p1595_p7 }
 0x287   : > { %p1602_p13 = por %p1601_p12, %p1600_p11 }
 0x289   : > { %p1603_p0 = pnand %p1602_p13, %p1596_p8 }
 0x28b   : > { %1606 = shalt.err (!%p1603_p0)
}
 0x28c   : > { %1528 = dma.vmem_to_hbm [thread:$0]  (%p1732_p5), %s1900_s20, 256, %s1898_s23, %s1388_s28  }
 0x28d PF: > { %p1534_p1 = scmp.ge.s32.totalorder %s1641_s27, 2  ;;  %s1414_s21 = sand.u32 1, %s1629_s24  }
 0x28e   : > { %s1415_s22 = scalar_lea.sflag [#allocation4], %s1414_s21 }
 0x28f   : > { %p1531_p2 = pnand %p1534_p1, %p1736_p6 }
 0x291   : > { %1624 = dma.done.wait (!%p1531_p2), %s1415_s22, 256  }
 0x292   : > { %1626 = vsyncadd (!%p1531_p2), %s1415_s22, 4294967040  ;;  %p17_p3 = scmp.ge.s32.totalorder %s1719_s30, 4   ;;  %s1950_s24 = smov %s1633_s25 }
 0x293   : > { %s1951_s25 = smov %s1637_s26  ;;  %s1952_s26 = smov %s1730_s10 }
 0x294   : > { %s1953_s27 = smov %s1719_s30  ;;  %19 = sbr.rel (!%p17_p3) target bundleno = 3 (0x3), region = 95 }
 0x29b   :  { %1420 = vsyncpa [#allocation4], 1 }
 0x29c   :  { %1422 = vsyncpa [#allocation4 + $0x1], 1 }

</bundles_post_ra>
